<compile_context>
chip_gen: v7x
topology: tpu7x:2x2x1
jax: 0.10.0
libtpu: 0.0.40
codegen_flags: <defaults>
</compile_context>

<pallas_src>
import jax
import jax.numpy as jnp
from jax.experimental import pallas as pl
from jax.experimental.pallas import tpu as pltpu


def gnn_kernel(a_ref, x_ref,
               w1_ref, b1_ref,
               w2_ref, b2_ref,
               w3_ref, b3_ref,
               wl_ref, bl_ref,
               o_ref):
    """One grid step == one graph.

    a_ref : (N, N) bf16 normalized adjacency (batch dim squeezed by BlockSpec)
    x_ref : (N, F) bf16 node features
    w*    : bf16 weights, b*: f32 biases (row vectors)
    o_ref : (1, O) f32 sigmoid output for this graph
    """
    bf = jnp.bfloat16
    a = a_ref[...]                                        # (N, N) bf16

    # ---- GCNConv 1: relu(A_hat @ (X @ W1) + b1) ----
    h = jnp.dot(x_ref[...], w1_ref[...], preferred_element_type=jnp.float32)
    h = jnp.dot(a, h.astype(bf), preferred_element_type=jnp.float32) + b1_ref[...]
    h = jnp.maximum(h, 0.0)                               # f32 epilogue
    # dropout(p=0.5) is identity in eval mode (training=False)

    # ---- GCNConv 2 ----
    h = jnp.dot(h.astype(bf), w2_ref[...], preferred_element_type=jnp.float32)
    h = jnp.dot(a, h.astype(bf), preferred_element_type=jnp.float32) + b2_ref[...]
    h = jnp.maximum(h, 0.0)

    # ---- GCNConv 3 ----
    h = jnp.dot(h.astype(bf), w3_ref[...], preferred_element_type=jnp.float32)
    h = jnp.dot(a, h.astype(bf), preferred_element_type=jnp.float32) + b3_ref[...]
    h = jnp.maximum(h, 0.0)

    # ---- global_mean_pool over this graph's nodes (XLU reduction, f32) ----
    pooled = jnp.mean(h, axis=0, keepdims=True)           # (1, H)

    # ---- Linear + sigmoid (sigmoid -> EUP slot) ----
    logits = jnp.dot(pooled.astype(bf), wl_ref[...],
                     preferred_element_type=jnp.float32) + bl_ref[...]
    o_ref[...] = jax.nn.sigmoid(logits)                   # (1, O) f32


def gnn_forward(a_hat, x, params):
    """a_hat: (B, N, N) normalized adjacency, x: (B, N, F) node features."""
    w1, b1, w2, b2, w3, b3, wl, bl = params
    B, N, F = x.shape
    H = w1.shape[1]
    O = wl.shape[1]

    bf = jnp.bfloat16
    a_bf = a_hat.astype(bf)
    x_bf = x.astype(bf)
    w1b, w2b, w3b, wlb = (w.astype(bf) for w in (w1, w2, w3, wl))
    b1f, b2f, b3f, blf = (b.astype(jnp.float32) for b in (b1, b2, b3, bl))

    # Advisory cost hint for the XLA scheduler.
    flops_per_graph = 2 * (N * F * H + 3 * N * N * H + 2 * N * H * H + H * O)
    bytes_accessed = ((a_bf.size + x_bf.size) * 2
                      + sum(w.size * 2 for w in (w1b, w2b, w3b, wlb))
                      + sum(b.size * 4 for b in (b1f, b2f, b3f, blf))
                      + B * O * 4)
    cost = pl.CostEstimate(flops=B * flops_per_graph,
                           transcendentals=B * O,
                           bytes_accessed=bytes_accessed)

    pinned = lambda g: (0, 0)   # same block every step -> weights stay resident in VMEM

    out = pl.pallas_call(
        gnn_kernel,
        out_shape=jax.ShapeDtypeStruct((B, 1, O), jnp.float32),
        grid=(B,),
        in_specs=[
            pl.BlockSpec((None, N, N), lambda g: (g, 0, 0)),   # A_hat[g]  (bf16)
            pl.BlockSpec((None, N, F), lambda g: (g, 0, 0)),   # X[g]      (bf16)
            pl.BlockSpec((F, H), pinned), pl.BlockSpec((1, H), pinned),   # W1, b1
            pl.BlockSpec((H, H), pinned), pl.BlockSpec((1, H), pinned),   # W2, b2
            pl.BlockSpec((H, H), pinned), pl.BlockSpec((1, H), pinned),   # W3, b3
            pl.BlockSpec((H, O), pinned), pl.BlockSpec((1, O), pinned),   # WL, bl
        ],
        out_specs=pl.BlockSpec((None, 1, O), lambda g: (g, 0, 0)),
        compiler_params=pltpu.CompilerParams(
            dimension_semantics=("parallel",)),   # v7x: 2 TCs split the batch
        cost_estimate=cost,
    )(a_bf, x_bf, w1b, b1f, w2b, b2f, w3b, b3f, wlb, blf)
    return out.reshape(B, O)


def build_normalized_adjacency(edge_index, num_nodes):
    """Dense D^-1/2 (A + I) D^-1/2 matching PyG GCNConv default normalization.

    Note: parallel (duplicate) edges are deduped here; PyG would sum them.
    Fine for the synthetic graphs used in this test.
    """
    src, dst = edge_index[0], edge_index[1]
    a = jnp.zeros((num_nodes, num_nodes), jnp.float32)
    # A[i, j] = 1 iff edge j -> i (A @ X aggregates incoming messages)
    a = a.at[dst, src].add(1.0)
    a = jnp.minimum(a, 1.0)
    a = a + jnp.eye(num_nodes, dtype=jnp.float32)          # self loops
    deg = jnp.sum(a, axis=1)
    dinv = jnp.where(deg > 0, 1.0 / jnp.sqrt(deg), 0.0)
    return a * dinv[:, None] * dinv[None, :]


def reference_forward_f32(a_hat, x, params):
    """Pure f32 reference (matches the PyTorch module semantics)."""
    w1, b1, w2, b2, w3, b3, wl, bl = params

    def single(a, xg):
        h = jnp.maximum(a @ (xg @ w1) + b1, 0.0)
        h = jnp.maximum(a @ (h @ w2) + b2, 0.0)
        h = jnp.maximum(a @ (h @ w3) + b3, 0.0)
        pooled = jnp.mean(h, axis=0, keepdims=True)
        return jax.nn.sigmoid(pooled @ wl + bl)[0]

    return jax.vmap(single)(a_hat, x)


def reference_forward_bf16(a_hat, x, params):
    """Reference matching the kernel's bf16-input / f32-accumulate numerics."""
    w1, b1, w2, b2, w3, b3, wl, bl = params
    bf = jnp.bfloat16
    a_hat = a_hat.astype(bf)
    x = x.astype(bf)
    w1, w2, w3, wl = (w.astype(bf) for w in (w1, w2, w3, wl))

    def single(a, xg):
        h = jnp.dot(xg, w1, preferred_element_type=jnp.float32)
        h = jnp.maximum(jnp.dot(a, h.astype(bf), preferred_element_type=jnp.float32) + b1, 0.0)
        h = jnp.dot(h.astype(bf), w2, preferred_element_type=jnp.float32)
        h = jnp.maximum(jnp.dot(a, h.astype(bf), preferred_element_type=jnp.float32) + b2, 0.0)
        h = jnp.dot(h.astype(bf), w3, preferred_element_type=jnp.float32)
        h = jnp.maximum(jnp.dot(a, h.astype(bf), preferred_element_type=jnp.float32) + b3, 0.0)
        pooled = jnp.mean(h, axis=0, keepdims=True)
        logits = jnp.dot(pooled.astype(bf), wl, preferred_element_type=jnp.float32) + bl
        return jax.nn.sigmoid(logits)[0]

    return jax.vmap(single)(a_hat, x)


if __name__ == "__main__":
    # Small shapes consistent with the module: B graphs, N nodes each.
    B, N, input_dim, hidden_dim, output_dim = 8, 16, 8, 32, 4

    key = jax.random.PRNGKey(0)
    k_x, k_e, k1, k2, k3, k4, kb = jax.random.split(key, 7)

    # Deterministic synthetic parameters (GCNConv: weight (in, out), bias (out,))
    w1 = jax.random.normal(k1, (input_dim, hidden_dim), jnp.float32) * 0.1
    b1 = jnp.zeros((1, hidden_dim), jnp.float32)
    w2 = jax.random.normal(k2, (hidden_dim, hidden_dim), jnp.float32) * 0.1
    b2 = jnp.zeros((1, hidden_dim), jnp.float32)
    w3 = jax.random.normal(k3, (hidden_dim, hidden_dim), jnp.float32) * 0.1
    b3 = jnp.zeros((1, hidden_dim), jnp.float32)
    wl = jax.random.normal(k4, (hidden_dim, output_dim), jnp.float32) * 0.1
    bl = jax.random.normal(kb, (1, output_dim), jnp.float32) * 0.1
    params = (w1, b1, w2, b2, w3, b3, wl, bl)

    # Deterministic node features and per-graph ring + chord edges (undirected).
    x = jax.random.normal(k_x, (B, N, input_dim), jnp.float32)
    ring_src = jnp.arange(N, dtype=jnp.int32)
    ring_dst = (ring_src + 1) % N
    a_list = []
    for g in range(B):
        kg = jax.random.fold_in(k_e, g)
        chord_src = jax.random.randint(kg, (4,), 0, N, dtype=jnp.int32)
        chord_dst = (chord_src + 3 + g) % N
        src = jnp.concatenate([ring_src, ring_dst, chord_src, chord_dst])
        dst = jnp.concatenate([ring_dst, ring_src, chord_dst, chord_src])
        edge_index = jnp.stack([src, dst], axis=0)
        a_list.append(build_normalized_adjacency(edge_index, N))
    a_hat = jnp.stack(a_list, axis=0)                      # (B, N, N) f32

    out = gnn_forward(a_hat, x, params)
    out = jax.block_until_ready(out)
    assert out.shape == (B, output_dim)

    ref_bf16 = reference_forward_bf16(a_hat, x, params)
    ref_f32 = reference_forward_f32(a_hat, x, params)
    assert jnp.allclose(out, ref_bf16, atol=2e-3, rtol=2e-3), (out, ref_bf16)
    assert jnp.allclose(out, ref_f32, atol=3e-2, rtol=3e-2), (out, ref_f32)

    print("KERNEL_OK")
</pallas_src>

<mosaic_0001>
module attributes {stable_mosaic.version = 11 : i64} {
  func.func @gnn_kernel(%arg0: i32, %arg1: memref<1x16x16xbf16, #tpu.memory_space<vmem>>, %arg2: memref<1x16x8xbf16, #tpu.memory_space<vmem>>, %arg3: memref<8x32xbf16, #tpu.memory_space<vmem>>, %arg4: memref<1x32xf32, #tpu.memory_space<vmem>>, %arg5: memref<32x32xbf16, #tpu.memory_space<vmem>>, %arg6: memref<1x32xf32, #tpu.memory_space<vmem>>, %arg7: memref<32x32xbf16, #tpu.memory_space<vmem>>, %arg8: memref<1x32xf32, #tpu.memory_space<vmem>>, %arg9: memref<32x4xbf16, #tpu.memory_space<vmem>>, %arg10: memref<1x4xf32, #tpu.memory_space<vmem>>, %arg11: memref<1x1x4xf32, #tpu.memory_space<vmem>>) attributes {dimension_semantics = [#tpu.dimension_semantics<parallel>], iteration_bounds = array<i64: 8>, scalar_prefetch = 0 : i64, scratch_operands = 0 : i64, tpu.core_type = #tpu.core_type<tc>, window_params = [{transform_indices = @transform_0, window_bounds = array<i64: 1, 16, 16>}, {transform_indices = @transform_1, window_bounds = array<i64: 1, 16, 8>}, {pipeline_mode = #tpu.pipeline_mode<synchronous>, transform_indices = @transform_2, window_bounds = array<i64: 8, 32>}, {pipeline_mode = #tpu.pipeline_mode<synchronous>, transform_indices = @transform_3, window_bounds = array<i64: 1, 32>}, {pipeline_mode = #tpu.pipeline_mode<synchronous>, transform_indices = @transform_4, window_bounds = array<i64: 32, 32>}, {pipeline_mode = #tpu.pipeline_mode<synchronous>, transform_indices = @transform_5, window_bounds = array<i64: 1, 32>}, {pipeline_mode = #tpu.pipeline_mode<synchronous>, transform_indices = @transform_6, window_bounds = array<i64: 32, 32>}, {pipeline_mode = #tpu.pipeline_mode<synchronous>, transform_indices = @transform_7, window_bounds = array<i64: 1, 32>}, {pipeline_mode = #tpu.pipeline_mode<synchronous>, transform_indices = @transform_8, window_bounds = array<i64: 32, 4>}, {pipeline_mode = #tpu.pipeline_mode<synchronous>, transform_indices = @transform_9, window_bounds = array<i64: 1, 4>}, {transform_indices = @transform_10, window_bounds = array<i64: 1, 1, 4>}]} {
    %c0 = arith.constant 0 : index
    %c0_0 = arith.constant 0 : index
    %c0_1 = arith.constant 0 : index
    %0 = vector.load %arg1[%c0, %c0_0, %c0_1] : memref<1x16x16xbf16, #tpu.memory_space<vmem>>, vector<1x16x16xbf16>
    %1 = vector.shape_cast %0 : vector<1x16x16xbf16> to vector<16x16xbf16>
    %c0_2 = arith.constant 0 : index
    %c0_3 = arith.constant 0 : index
    %c0_4 = arith.constant 0 : index
    %2 = vector.load %arg2[%c0_2, %c0_3, %c0_4] : memref<1x16x8xbf16, #tpu.memory_space<vmem>>, vector<1x16x8xbf16>
    %3 = vector.shape_cast %2 : vector<1x16x8xbf16> to vector<16x8xbf16>
    %c0_5 = arith.constant 0 : index
    %c0_6 = arith.constant 0 : index
    %4 = vector.load %arg3[%c0_5, %c0_6] : memref<8x32xbf16, #tpu.memory_space<vmem>>, vector<8x32xbf16>
    %cst = arith.constant dense<0.000000e+00> : vector<16x32xf32>
    %5 = tpu.matmul %3, %4, %cst {dimension_numbers = #tpu.dot_dimension_numbers<[1], [0], [0], [1], [0, 0, 1, 1], [], []>} : vector<16x8xbf16>, vector<8x32xbf16>, vector<16x32xf32> -> vector<16x32xf32>
    %6 = arith.truncf %5 : vector<16x32xf32> to vector<16x32xbf16>
    %cst_7 = arith.constant dense<0.000000e+00> : vector<16x32xf32>
    %7 = tpu.matmul %1, %6, %cst_7 {dimension_numbers = #tpu.dot_dimension_numbers<[1], [0], [0], [1], [0, 0, 1, 1], [], []>} : vector<16x16xbf16>, vector<16x32xbf16>, vector<16x32xf32> -> vector<16x32xf32>
    %c0_8 = arith.constant 0 : index
    %c0_9 = arith.constant 0 : index
    %8 = vector.load %arg4[%c0_8, %c0_9] : memref<1x32xf32, #tpu.memory_space<vmem>>, vector<1x32xf32>
    %9 = vector.broadcast %8 : vector<1x32xf32> to vector<16x32xf32>
    %10 = arith.addf %7, %9 : vector<16x32xf32>
    %cst_10 = arith.constant 0.000000e+00 : f32
    %11 = vector.broadcast %cst_10 : f32 to vector<16x32xf32>
    %12 = arith.maximumf %10, %11 : vector<16x32xf32>
    %13 = arith.truncf %12 : vector<16x32xf32> to vector<16x32xbf16>
    %c0_11 = arith.constant 0 : index
    %c0_12 = arith.constant 0 : index
    %14 = vector.load %arg5[%c0_11, %c0_12] : memref<32x32xbf16, #tpu.memory_space<vmem>>, vector<32x32xbf16>
    %cst_13 = arith.constant dense<0.000000e+00> : vector<16x32xf32>
    %15 = tpu.matmul %13, %14, %cst_13 {dimension_numbers = #tpu.dot_dimension_numbers<[1], [0], [0], [1], [0, 0, 1, 1], [], []>} : vector<16x32xbf16>, vector<32x32xbf16>, vector<16x32xf32> -> vector<16x32xf32>
    %16 = arith.truncf %15 : vector<16x32xf32> to vector<16x32xbf16>
    %cst_14 = arith.constant dense<0.000000e+00> : vector<16x32xf32>
    %17 = tpu.matmul %1, %16, %cst_14 {dimension_numbers = #tpu.dot_dimension_numbers<[1], [0], [0], [1], [0, 0, 1, 1], [], []>} : vector<16x16xbf16>, vector<16x32xbf16>, vector<16x32xf32> -> vector<16x32xf32>
    %c0_15 = arith.constant 0 : index
    %c0_16 = arith.constant 0 : index
    %18 = vector.load %arg6[%c0_15, %c0_16] : memref<1x32xf32, #tpu.memory_space<vmem>>, vector<1x32xf32>
    %19 = vector.broadcast %18 : vector<1x32xf32> to vector<16x32xf32>
    %20 = arith.addf %17, %19 : vector<16x32xf32>
    %cst_17 = arith.constant 0.000000e+00 : f32
    %21 = vector.broadcast %cst_17 : f32 to vector<16x32xf32>
    %22 = arith.maximumf %20, %21 : vector<16x32xf32>
    %23 = arith.truncf %22 : vector<16x32xf32> to vector<16x32xbf16>
    %c0_18 = arith.constant 0 : index
    %c0_19 = arith.constant 0 : index
    %24 = vector.load %arg7[%c0_18, %c0_19] : memref<32x32xbf16, #tpu.memory_space<vmem>>, vector<32x32xbf16>
    %cst_20 = arith.constant dense<0.000000e+00> : vector<16x32xf32>
    %25 = tpu.matmul %23, %24, %cst_20 {dimension_numbers = #tpu.dot_dimension_numbers<[1], [0], [0], [1], [0, 0, 1, 1], [], []>} : vector<16x32xbf16>, vector<32x32xbf16>, vector<16x32xf32> -> vector<16x32xf32>
    %26 = arith.truncf %25 : vector<16x32xf32> to vector<16x32xbf16>
    %cst_21 = arith.constant dense<0.000000e+00> : vector<16x32xf32>
    %27 = tpu.matmul %1, %26, %cst_21 {dimension_numbers = #tpu.dot_dimension_numbers<[1], [0], [0], [1], [0, 0, 1, 1], [], []>} : vector<16x16xbf16>, vector<16x32xbf16>, vector<16x32xf32> -> vector<16x32xf32>
    %c0_22 = arith.constant 0 : index
    %c0_23 = arith.constant 0 : index
    %28 = vector.load %arg8[%c0_22, %c0_23] : memref<1x32xf32, #tpu.memory_space<vmem>>, vector<1x32xf32>
    %29 = vector.broadcast %28 : vector<1x32xf32> to vector<16x32xf32>
    %30 = arith.addf %27, %29 : vector<16x32xf32>
    %cst_24 = arith.constant 0.000000e+00 : f32
    %31 = vector.broadcast %cst_24 : f32 to vector<16x32xf32>
    %32 = arith.maximumf %30, %31 : vector<16x32xf32>
    %cst_25 = arith.constant dense<0.000000e+00> : vector<32xf32>
    %33 = vector.multi_reduction <add>, %32, %cst_25 [0] : vector<16x32xf32> to vector<32xf32>
    %34 = vector.shape_cast %33 : vector<32xf32> to vector<1x32xf32>
    %cst_26 = arith.constant 1.600000e+01 : f32
    %35 = vector.broadcast %cst_26 : f32 to vector<1x32xf32>
    %36 = arith.divf %34, %35 : vector<1x32xf32>
    %37 = arith.truncf %36 : vector<1x32xf32> to vector<1x32xbf16>
    %c0_27 = arith.constant 0 : index
    %c0_28 = arith.constant 0 : index
    %38 = vector.load %arg9[%c0_27, %c0_28] : memref<32x4xbf16, #tpu.memory_space<vmem>>, vector<32x4xbf16>
    %cst_29 = arith.constant dense<0.000000e+00> : vector<1x4xf32>
    %39 = tpu.matmul %37, %38, %cst_29 {dimension_numbers = #tpu.dot_dimension_numbers<[1], [0], [0], [1], [0, 0, 1, 1], [], []>} : vector<1x32xbf16>, vector<32x4xbf16>, vector<1x4xf32> -> vector<1x4xf32>
    %c0_30 = arith.constant 0 : index
    %c0_31 = arith.constant 0 : index
    %40 = vector.load %arg10[%c0_30, %c0_31] : memref<1x4xf32, #tpu.memory_space<vmem>>, vector<1x4xf32>
    %41 = arith.addf %39, %40 : vector<1x4xf32>
    %42 = arith.negf %41 : vector<1x4xf32>
    %43 = math.exp %42 : vector<1x4xf32>
    %cst_32 = arith.constant 1.000000e+00 : f32
    %44 = vector.broadcast %cst_32 : f32 to vector<1x4xf32>
    %45 = arith.addf %44, %43 : vector<1x4xf32>
    %46 = arith.divf %44, %45 : vector<1x4xf32>
    %c0_33 = arith.constant 0 : index
    %c0_34 = arith.constant 0 : index
    %c0_35 = arith.constant 0 : index
    %47 = vector.load %arg11[%c0_33, %c0_34, %c0_35] : memref<1x1x4xf32, #tpu.memory_space<vmem>>, vector<1x1x4xf32>
    %48 = vector.shape_cast %47 : vector<1x1x4xf32> to vector<1x4xf32>
    %49 = vector.shape_cast %46 : vector<1x4xf32> to vector<1x1x4xf32>
    tpu.vector_store %arg11[%c0_33, %c0_34, %c0_35], %49 {strides = array<i32>} : memref<1x1x4xf32, #tpu.memory_space<vmem>>, vector<1x1x4xf32>,
    return
  }
  func.func @transform_0(%arg0: i32) -> (i32, i32, i32) {
    %c0_i32 = arith.constant 0 : i32
    %c0_i32_0 = arith.constant 0 : i32
    %c0_i32_1 = arith.constant 0 : i32
    return %arg0, %c0_i32, %c0_i32_0 : i32, i32, i32
  }
  func.func @transform_1(%arg0: i32) -> (i32, i32, i32) {
    %c0_i32 = arith.constant 0 : i32
    %c0_i32_0 = arith.constant 0 : i32
    %c0_i32_1 = arith.constant 0 : i32
    return %arg0, %c0_i32, %c0_i32_0 : i32, i32, i32
  }
  func.func @transform_2(%arg0: i32) -> (i32, i32) {
    %c0_i32 = arith.constant 0 : i32
    %c0_i32_0 = arith.constant 0 : i32
    %c0_i32_1 = arith.constant 0 : i32
    return %c0_i32, %c0_i32_0 : i32, i32
  }
  func.func @transform_3(%arg0: i32) -> (i32, i32) {
    %c0_i32 = arith.constant 0 : i32
    %c0_i32_0 = arith.constant 0 : i32
    %c0_i32_1 = arith.constant 0 : i32
    return %c0_i32, %c0_i32_0 : i32, i32
  }
  func.func @transform_4(%arg0: i32) -> (i32, i32) {
    %c0_i32 = arith.constant 0 : i32
    %c0_i32_0 = arith.constant 0 : i32
    %c0_i32_1 = arith.constant 0 : i32
    return %c0_i32, %c0_i32_0 : i32, i32
  }
  func.func @transform_5(%arg0: i32) -> (i32, i32) {
    %c0_i32 = arith.constant 0 : i32
    %c0_i32_0 = arith.constant 0 : i32
    %c0_i32_1 = arith.constant 0 : i32
    return %c0_i32, %c0_i32_0 : i32, i32
  }
  func.func @transform_6(%arg0: i32) -> (i32, i32) {
    %c0_i32 = arith.constant 0 : i32
    %c0_i32_0 = arith.constant 0 : i32
    %c0_i32_1 = arith.constant 0 : i32
    return %c0_i32, %c0_i32_0 : i32, i32
  }
  func.func @transform_7(%arg0: i32) -> (i32, i32) {
    %c0_i32 = arith.constant 0 : i32
    %c0_i32_0 = arith.constant 0 : i32
    %c0_i32_1 = arith.constant 0 : i32
    return %c0_i32, %c0_i32_0 : i32, i32
  }
  func.func @transform_8(%arg0: i32) -> (i32, i32) {
    %c0_i32 = arith.constant 0 : i32
    %c0_i32_0 = arith.constant 0 : i32
    %c0_i32_1 = arith.constant 0 : i32
    return %c0_i32, %c0_i32_0 : i32, i32
  }
  func.func @transform_9(%arg0: i32) -> (i32, i32) {
    %c0_i32 = arith.constant 0 : i32
    %c0_i32_0 = arith.constant 0 : i32
    %c0_i32_1 = arith.constant 0 : i32
    return %c0_i32, %c0_i32_0 : i32, i32
  }
  func.func @transform_10(%arg0: i32) -> (i32, i32, i32) {
    %c0_i32 = arith.constant 0 : i32
    %c0_i32_0 = arith.constant 0 : i32
    %c0_i32_1 = arith.constant 0 : i32
    return %arg0, %c0_i32, %c0_i32_0 : i32, i32, i32
  }
}

</mosaic_0001>

<bundles_post_ra>
// kernel: tpu_custom_call.1
= control target key start
LH: loop header
LB: loop body
LE: loop exit
PB: predicated region body
PF: predicated region fallthrough
CT: control target
= control target key end

     0   :  { %s1044_s13 = smov 0   ;;  %s1133_s0 = inlined_call_operand.vmem [shape: bf16[8,16,16], index: 0, kind: input, shape index: {}]   ;;  %s1134_s1 = inlined_call_operand.vmem [shape: bf16[8,16,8], index: 1, kind: input, shape index: {}]   ;;  %s1135_s2 = inlined_call_operand.vmem [shape: bf16[8,32], index: 2, kind: input, shape index: {}]   ;;  %s1136_s3 = inlined_call_operand.vmem [shape: f32[1,32], index: 3, kind: input, shape index: {}]   ;;  %s1137_s4 = inlined_call_operand.vmem [shape: bf16[32,32], index: 4, kind: input, shape index: {}]   ;;  %s1138_s5 = inlined_call_operand.vmem [shape: f32[1,32], index: 5, kind: input, shape index: {}]   ;;  %s1139_s6 = inlined_call_operand.vmem [shape: bf16[32,32], index: 6, kind: input, shape index: {}]   ;;  %s1140_s7 = inlined_call_operand.vmem [shape: f32[1,32], index: 7, kind: input, shape index: {}]   ;;  %s1141_s8 = inlined_call_operand.vmem [shape: bf16[32,4], index: 8, kind: input, shape index: {}]   ;;  %s1142_s9 = inlined_call_operand.vmem [shape: f32[1,4], index: 9, kind: input, shape index: {}]   ;;  %s1143_s10 = inlined_call_operand.vmem [shape: f32[8,1,4], index: 10, kind: output, shape index: {}]  }
   0x1 LB: > { %s860_s14 = sadd.s32 4294967295, %s985_s13   ;;  %p864_p0 = scmp.ge.s32.totalorder %s985_s13, 1  ;;  %s985_s13 = sphi %s1044_s13, %s20_s13  }
   0x2   : > { %p322_p1 = scmp.lt.s32.totalorder %s985_s13, 9 }
   0x4   : > { %p323_p2 = pnand %p864_p0, %p322_p1 }
   0x5   : > { %v381_v0 = vld [vmem:[%s1135_s2] sm:$0xf] (!%p323_p2)  ;;  %vm391_vm0 = vcmask (!%p323_p2), 1043456   ;;  %p363_p3 = scmp.lt.s32.totalorder (!%p323_p2), %s860_s14, 7  ;;  %v987_v1 = vmov (!%p323_p2), 0.0   ;;  %vm988_vm1 = vmmov (!%p323_p2), 0  }
   0x6   : > { %326 = sbr.rel (%p323_p2) target bundleno = 1592 (0x638), region = 60  ;;  %909 = vmatprep.subr.bf16.mxu0 (!%p323_p2), %v987_v1  ;;  %v393_v2 = vsel (!%p323_p2), %vm391_vm0, %v381_v0, 0  ;;  %911 = vmatprep.mubr.msk.bf16.mxu0 (!%p323_p2), %vm988_vm1, %v987_v1  ;;  %vm387_vm2 = vcmask (!%p323_p2), 64512   ;;  %vm449_vm3 = vcmask (!%p323_p2), 130048   ;;  %v969_v10 = vld [vmem:[%s1137_s4] sm:$0xff] (!%p323_p2)   ;;  %v970_v11 = vld [vmem:[%s1137_s4 + $0x8] sm:$0xff] (!%p323_p2)  }
   0x7   : > { %910 = vmatpush3.bf16.msra.mxu0 (!%p323_p2), %v393_v2  ;;  %915 = vmatprep.subr.bf16.mxu1 (!%p323_p2), %v987_v1  ;;  %v871_v12 = vld [vmem:[%s1136_s3] ss:$0 sm:$0xff] (!%p323_p2)  ;;  %vm513_vm4 = vcmask (!%p323_p2), 261120   ;;  %v972_v28 = vld [vmem:[%s1139_s6 + $0x8] sm:$0xff] (!%p323_p2)   ;;  %vm799_vm5 = vcmask (!%p323_p2), 24576  }
   0x8   : > { %917 = vmatprep.mubr.msk.bf16.mxu1 (!%p323_p2), %vm988_vm1, %v987_v1  ;;  %921 = vmatprep.subr.bf16.mxu0 (!%p323_p2), %v987_v1  ;;  %v971_v27 = vld [vmem:[%s1139_s6] sm:$0xff] (!%p323_p2)   ;;  %v974_v45 = vld [vmem:[%s1141_s8 + $0x8] sm:$0xff] (!%p323_p2)  }
   0x9   : > { %v877_v29 = vld [vmem:[%s1138_s5] ss:$0 sm:$0xff] (!%p323_p2) }
   0xa   : > { %v973_v44 = vld [vmem:[%s1141_s8] sm:$0xff] (!%p323_p2)  }
   0xb   : > { %v882_v46 = vld [vmem:[%s1140_s7] ss:$0 sm:$0xff] (!%p323_p2) }
   0xc   : > { %v737_v2 = vld [vmem:[%s1142_s9] sm:$0x1] (!%p323_p2) }
   0xd   : > { %s1145_s14 = smov (!%p363_p3, %s860_s14), 7 }
   0xe   : > { %s890_s17 = sshll.u32 %s1145_s14, 3  ;;  %s375_s28 = scalar_lea.vmem %s1143_s10, %s1145_s14 }
   0xf   : > { %s372_s20 = scalar_lea.vmem %s1134_s1, %s890_s17  ;;  %s367_s23 = scalar_lea.vmem %s1133_s0, %s890_s17 }
  0x10   : > { %v967_v3 = vld [vmem:[%s372_s20] sm:$0xff]  }
  0x11   : > { %912 = vmatmul.mubr.msk.bf16.vlgmr.msra.gmra.mrb[0].mxu0 %vm387_vm2, %v967_v3  ;;  %v968_v9 = vld [vmem:[%s367_s23] sm:$0xff]  }
  0x12   : > { %925 = vmatprep.mubr.msk.bf16.mxu0 %vm988_vm1, %v987_v1  ;;  %922 = vmatpush3.bf16.msra.mxu0 %v969_v10 }
  0x13   : > { %923 = vmatprep.subr.bf16.mxu0 %v987_v1 }
  0x16   : > { %924 = vmatpush3.bf16.msra.mxu0 %v970_v11 }
  0x17   : > { %935 = vmatprep.subr.bf16.mxu0 %v987_v1 }
  0xe4   : > { %v429_v4 = vpop.f32.mrb[0].mxu0 }
  0xe5   : > { %v913_v5 = vpop.f32.mrb[1].mxu0 }
  0xe6   : > { %v432_v6 = vpop.f32.mrb[2].mxu0 }
  0xe7   : > { %v436_v7 = vpack.c.bf16 %v432_v6, %v429_v4  ;;  %v914_v8 = vpop.f32.mrb[3].mxu0 }
  0xe9   : > { %916 = vmatpush3.bf16.msra.mxu1 %v436_v7 }
  0xea   : > { %929 = vmatprep.subr.bf16.mxu1 %v987_v1 }
  0xec   : > { %918 = vmatmul.mubr.msk.bf16.vlgmr.msra.gmra.mrb[0].mxu1 %vm449_vm3, %v968_v9 }
  0xed   : > { %931 = vmatprep.mubr.msk.bf16.mxu1 %vm988_vm1, %v987_v1 }
 0x1bf   : > { %v487_v13 = vpop.f32.mrb[0].mxu1 }
 0x1c0   : > { %v488_v14 = vadd.f32 %v871_v12, %v487_v13  ;;  %v919_v15 = vpop.f32.mrb[1].mxu1 }
 0x1c1   : > { %v490_v16 = vpop.f32.mrb[2].mxu1 }
 0x1c2   : > { %v491_v17 = vadd.f32 %v871_v12, %v490_v16  ;;  %v920_v18 = vpop.f32.mrb[3].mxu1  ;;  %v494_v19 = vmax.f32 %v488_v14, 0.0 }
 0x1c4   : > { %v495_v20 = vmax.f32 %v491_v17, 0.0 }
 0x1c6   : > { %v496_v21 = vpack.c.bf16 %v495_v20, %v494_v19 }
 0x1c8   : > { %926 = vmatmul.mubr.msk.bf16.vlgmr.msra.gmra.mrb[4].mxu0 %vm513_vm4, %v496_v21 }
 0x1c9   : > { %939 = vmatprep.mubr.msk.bf16.mxu0 %vm988_vm1, %v987_v1  ;;  %936 = vmatpush3.bf16.msra.mxu0 %v971_v27 }
 0x1ca   : > { %937 = vmatprep.subr.bf16.mxu0 %v987_v1 }
 0x1cd   : > { %938 = vmatpush3.bf16.msra.mxu0 %v972_v28 }
 0x1ce   : > { %949 = vmatprep.subr.bf16.mxu0 %v987_v1 }
 0x29b   : > { %v551_v22 = vpop.f32.mrb[4].mxu0 }
 0x29c   : > { %v927_v23 = vpop.f32.mrb[5].mxu0 }
 0x29d   : > { %v554_v24 = vpop.f32.mrb[6].mxu0 }
 0x29e   : > { %v558_v25 = vpack.c.bf16 %v554_v24, %v551_v22  ;;  %v928_v26 = vpop.f32.mrb[7].mxu0 }
 0x2a0   : > { %930 = vmatpush3.bf16.msra.mxu1 %v558_v25 }
 0x2a1   : > { %943 = vmatprep.subr.bf16.mxu1 %v987_v1 }
 0x2a3   : > { %932 = vmatmul.mubr.msk.bf16.vlgmr.msra.gmra.mrb[4].mxu1 %vm449_vm3, %v968_v9 }
 0x2a4   : > { %945 = vmatprep.mubr.msk.bf16.mxu1 %vm988_vm1, %v987_v1 }
 0x376   : > { %v600_v30 = vpop.f32.mrb[4].mxu1 }
 0x377   : > { %v601_v31 = vadd.f32 %v877_v29, %v600_v30  ;;  %v933_v32 = vpop.f32.mrb[5].mxu1 }
 0x378   : > { %v603_v33 = vpop.f32.mrb[6].mxu1 }
 0x379   : > { %v604_v34 = vadd.f32 %v877_v29, %v603_v33  ;;  %v934_v35 = vpop.f32.mrb[7].mxu1  ;;  %v607_v36 = vmax.f32 %v601_v31, 0.0 }
 0x37b   : > { %v608_v37 = vmax.f32 %v604_v34, 0.0 }
 0x37d   : > { %v609_v38 = vpack.c.bf16 %v608_v37, %v607_v36 }
 0x37f   : > { %940 = vmatmul.mubr.msk.bf16.vlgmr.msra.gmra.mrb[8].mxu0 %vm513_vm4, %v609_v38 }
 0x380   : > { %953 = vmatprep.mubr.msk.bf16.mxu0 %vm988_vm1, %v987_v1  ;;  %950 = vmatpush3.bf16.msra.mxu0 %v973_v44 }
 0x381   : > { %951 = vmatprep.subr.bf16.mxu0 %v987_v1 }
 0x384   : > { %952 = vmatpush3.bf16.msra.mxu0 %v974_v45 }
 0x452   : > { %v663_v39 = vpop.f32.mrb[8].mxu0 }
 0x453   : > { %v941_v40 = vpop.f32.mrb[9].mxu0 }
 0x454   : > { %v666_v41 = vpop.f32.mrb[10].mxu0 }
 0x455   : > { %v670_v42 = vpack.c.bf16 %v666_v41, %v663_v39  ;;  %v942_v43 = vpop.f32.mrb[11].mxu0 }
 0x457   : > { %944 = vmatpush3.bf16.msra.mxu1 %v670_v42 }
 0x45a   : > { %946 = vmatmul.mubr.msk.bf16.vlgmr.msra.gmra.mrb[8].mxu1 %vm449_vm3, %v968_v9 }
 0x52d   : > { %v712_v47 = vpop.f32.mrb[8].mxu1 }
 0x52e   : > { %v713_v48 = vadd.f32 %v882_v46, %v712_v47  ;;  %v947_v49 = vpop.f32.mrb[9].mxu1 }
 0x52f   : > { %v715_v50 = vpop.f32.mrb[10].mxu1 }
 0x530   : > { %v719_v51 = vmax.f32 %v713_v48, 0.0  ;;  %v716_v52 = vadd.f32 %v882_v46, %v715_v50  ;;  %v948_v53 = vpop.f32.mrb[11].mxu1 }
 0x532   : > { %v720_v54 = vmax.f32 %v716_v52, 0.0  ;;  %v721_v55 = vsel %vm513_vm4, %v719_v51, 0.0 }
 0x534   : > { %v722_v56 = vsel %vm513_vm4, %v720_v54, 0.0 }
 0x535   : > { %v723_v57 = vadd.f32 %v722_v56, %v721_v55 }
 0x537   : > { %v724_v58 = vrot.slane %v723_v57, 4 }
 0x539   : > { %v725_v59 = vadd.f32 %v724_v58, %v723_v57 }
 0x53b   : > { %v726_v60 = vrot.slane %v725_v59, 2 }
 0x53d   : > { %v727_v61 = vadd.f32 %v726_v60, %v725_v59 }
 0x53f   : > { %v728_v62 = vrot.slane %v727_v61, 1 }
 0x541   : > { %v729_v63 = vadd.f32 %v728_v62, %v727_v61 }
 0x543   : > { %v731_v0 = vmul.f32 0.0625, %v729_v63 }
 0x545   : > { %v732_v1 = vpack.c.bf16 %v731_v0, %v731_v0 }
 0x547   : > { %954 = vmatmul.mubr.msk.bf16.vlgmr.msra.gmra.mrb[12].mxu0 %vm513_vm4, %v732_v1 }
 0x61a   : > { %v787_v3 = vpop.f32.mrb[12].mxu0 }
 0x61b   : > { %v788_v4 = vadd.f32 %v787_v3, %v737_v2  ;;  %v955_v5 = vpop.f32.mrb[13].mxu0 }
 0x61c   : > { %v790_v6 = vpop.f32.mrb[14].mxu0 }
 0x61d   : > { %v887_v7 = vmul.f32 -1.442695, %v788_v4  ;;  %v956_v8 = vpop.f32.mrb[15].mxu0 }
 0x61f   : > { %975 = vpow2.f32 %v887_v7 }
 0x629   : > { %v976_v9 = vpop.eup %975 }
 0x62a   : > { %v796_v10 = vadd.f32 1.0, %v976_v9 }
 0x62c   : > { %977 = vrcp.f32 %v796_v10 }
 0x636   : > { %v978_v11 = vpop.eup %977 }
 0x637   : > { %800 = vst.msk [vmem:[%s375_s28] sm:$0x1] %vm799_vm5, %v978_v11 }
 0x638 PF: > { %s20_s13 = sadd.s32 1, %s985_s13  }
 0x639   : > { %p17_p4 = scmp.ge.s32.totalorder %s20_s13, 10  }
 0x63b   :  { %19 = sbr.rel (!%p17_p4) target bundleno = 1 (0x1), region = 93 }

</bundles_post_ra>
